<compile_context>
chip_gen: v5e
topology: v5e:2x2
jax: 0.10.0
libtpu: 0.0.40
codegen_flags: <defaults>
</compile_context>

<pallas_src>
import jax
import jax.numpy as jnp
from jax import lax
from jax.experimental import pallas as pl
from jax.experimental.pallas import tpu as pltpu

_SUBLANE = 8
_LANE = 128


def _round_up(x, m):
    return -(-x // m) * m


def _default_vmem_budget_and_limit():
    """Generation-aware (budget, vmem_limit) in bytes."""
    cap = None
    try:
        cap = getattr(pltpu.get_tpu_info(), "vmem_capacity_bytes", None)
    except Exception:
        cap = None
    if cap is not None and cap >= 96 * 1024 * 1024:
        # v5e / v6e: 128 MiB physical VMEM per TensorCore.
        return 48 * 1024 * 1024, 96 * 1024 * 1024
    # v7x (64 MiB per TC) or unknown chip: conservative, works everywhere.
    return 20 * 1024 * 1024, 40 * 1024 * 1024


def _fit_tile(dim, max_tile, granularity):
    """Largest tile (multiple of `granularity`, <= max_tile) minimizing padding.

    Returns (tile, padded_dim) with padded_dim = tile * num_tiles >= dim.
    """
    max_tile = max(granularity, (max_tile // granularity) * granularity)
    full = _round_up(dim, granularity)
    if max_tile >= full:
        return full, full
    n_tiles = -(-dim // max_tile)
    tile = _round_up(-(-dim // n_tiles), granularity)
    return tile, tile * n_tiles


def _plan_blocks(n_mics, n_freqs, n_frames, budget_bytes):
    """Pick (freq_tile, frame_tile, padded_F, padded_T) from a VMEM budget.

    Double-buffered per-grid-step VMEM footprint of the streamed blocks:
        2 bufs * 4 B * [2*M*Ft*Tt (xr+xi) + 2*Ft*Tt (out_r+out_i)]
      = 16 * (M + 1) * Ft * Tt  bytes   (+ small per-tile weights)
    The estimate uses the internal (8,128)-padded layout sizes, but when
    everything fits the block dims equal the *exact* array dims, so the mixture
    never has to be padded/copied in HBM.
    """
    per_row_frame = 16 * (n_mics + 1)
    f_int = _round_up(n_freqs, _SUBLANE)
    t_int = _round_up(n_frames, _LANE)

    if per_row_frame * f_int * t_int <= budget_bytes:
        # Common path: full-dim blocks, no padding anywhere.
        return n_freqs, n_frames, n_freqs, n_frames

    # Genuinely tiled fallback: blocks must be (8,128)-aligned and divide evenly.
    ft_budget = budget_bytes // (per_row_frame * t_int)
    if ft_budget >= _SUBLANE:
        # Keep all frames in one block (best weight reuse), grow the freq tile.
        ft, f_pad = _fit_tile(n_freqs, ft_budget, _SUBLANE)
        tt, t_pad = t_int, t_int
    else:
        # Frames alone overflow the budget: tile frames, keep 8 freq rows.
        ft, f_pad = _SUBLANE, _round_up(n_freqs, _SUBLANE)
        tt_budget = max(_LANE, budget_bytes // (per_row_frame * _SUBLANE))
        tt, t_pad = _fit_tile(n_frames, tt_budget, _LANE)
    return ft, tt, f_pad, t_pad


def _apply_bf_kernel(wr_ref, wi_ref, xr_ref, xi_ref, or_ref, oi_ref):
    """One (batch, freq-tile, frame-tile) block.

    wr/wi : (1, Ft, M)     beamforming weights for this freq tile
    xr/xi : (1, M, Ft, Tt) mixture block (real / imag)
    or/oi : (1, Ft, Tt)    filtered output block (real / imag)

    out = sum_m conj(w_m) * x_m = sum_m (wr - i*wi)(xr + i*xi)
        -> real: wr*xr + wi*xi ;  imag: wr*xi - wi*xr
    """
    ft, tt = or_ref.shape[1], or_ref.shape[2]
    n_mics = xr_ref.shape[1]

    wr = wr_ref[0]                                # (Ft, M)
    wi = wi_ref[0]

    acc_r = None
    acc_i = None
    for m in range(n_mics):                       # mics are tiny & static -> unrolled
        xr_m = xr_ref[0, m]                       # (Ft, Tt)
        xi_m = xi_ref[0, m]
        # Hoist the lane-broadcast of the weight column: exactly two cross-lane
        # splats per mic, reused by both accumulators (JAX won't CSE these).
        wrb = jnp.broadcast_to(wr[:, m:m + 1], (ft, tt))
        wib = jnp.broadcast_to(wi[:, m:m + 1], (ft, tt))
        if m == 0:
            acc_r = wrb * xr_m + wib * xi_m
            acc_i = wrb * xi_m - wib * xr_m
        else:
            acc_r = acc_r + wrb * xr_m + wib * xi_m
            acc_i = acc_i + wrb * xi_m - wib * xr_m

    or_ref[0] = acc_r
    oi_ref[0] = acc_i


def _apply_beamforming_pallas(wr, wi, xr, xi, freq_tile, frame_tile, vmem_limit_bytes):
    """wr/wi: (B, F, M) f32; xr/xi: (B, M, F, T) f32 -> two (B, F, T) f32 arrays."""
    B, M, F, T = xr.shape
    assert F % freq_tile == 0 and T % frame_tile == 0

    grid = (B, F // freq_tile, T // frame_tile)

    w_spec = pl.BlockSpec((1, freq_tile, M), lambda b, f, t: (b, f, 0))
    x_spec = pl.BlockSpec((1, M, freq_tile, frame_tile), lambda b, f, t: (b, 0, f, t))
    o_spec = pl.BlockSpec((1, freq_tile, frame_tile), lambda b, f, t: (b, f, t))

    out_shape = (jax.ShapeDtypeStruct((B, F, T), jnp.float32),
                 jax.ShapeDtypeStruct((B, F, T), jnp.float32))

    return pl.pallas_call(
        _apply_bf_kernel,
        out_shape=out_shape,
        grid_spec=pltpu.PrefetchScalarGridSpec(
            num_scalar_prefetch=0,
            grid=grid,
            in_specs=[w_spec, w_spec, x_spec, x_spec],
            out_specs=[o_spec, o_spec],
        ),
        compiler_params=pltpu.CompilerParams(
            dimension_semantics=("parallel", "parallel", "parallel"),
            vmem_limit_bytes=vmem_limit_bytes,
            # Allow XLA to fuse the real/imag extraction of `mix` into the
            # pallas_call input pipeline instead of a separate HBM pass.
            allow_input_fusion=[False, False, True, True],
        ),
    )(wr, wi, xr, xi)


def _solve_bf_weights(target_scm, noise_scm, mu, ref_mic):
    """w = ((target + mu*noise)^-1 @ target)[..., ref_mic] per (batch, freq).

    The denominator is Hermitian PSD (sum of SCMs), so instead of a batched
    general LU we Cholesky-factor the symmetric-PD real 2Mx2M block embedding
    and run two batched triangular solves.  Returns (wr, wi): (B, F, M) f32.
    """
    t = jnp.transpose(target_scm, (0, 3, 1, 2))   # (B, F, M, M)
    n = jnp.transpose(noise_scm, (0, 3, 1, 2))    # (B, F, M, M)
    den = t + mu * n
    M = t.shape[-1]

    Ar = jnp.real(den).astype(jnp.float32)
    Ai = jnp.imag(den).astype(jnp.float32)
    Br = jnp.real(t).astype(jnp.float32)
    Bi = jnp.imag(t).astype(jnp.float32)
    A_real = jnp.concatenate(
        [jnp.concatenate([Ar, -Ai], axis=-1),
         jnp.concatenate([Ai, Ar], axis=-1)], axis=-2)   # (B, F, 2M, 2M) sym PD
    B_real = jnp.concatenate([Br, Bi], axis=-2)          # (B, F, 2M, M)

    L = lax.linalg.cholesky(A_real)                                          # lower
    Y = lax.linalg.triangular_solve(L, B_real, left_side=True, lower=True)   # L Y = B
    X = lax.linalg.triangular_solve(L, Y, left_side=True, lower=True,
                                    transpose_a=True)                        # L^T X = Y
    wr = X[..., :M, ref_mic]                              # (B, F, M)
    wi = X[..., M:, ref_mic]
    return wr, wi


def sdw_mwf_beamformer(mix, target_scm, noise_scm, mu=1.0, ref_mic=0,
                       vmem_budget_bytes=None, return_real_imag=False):
    """mix: complex64 (B, M, F, T); target_scm / noise_scm: complex64 (B, M, M, F).

    Returns complex64 (B, F, T) (or an (out_r, out_i) f32 pair if
    return_real_imag=True), matching SdwMwfBeamformer.forward.
    """
    B, M, F, T = mix.shape

    budget, vmem_limit = _default_vmem_budget_and_limit()
    if vmem_budget_bytes is not None:
        budget = vmem_budget_bytes

    # --- beamforming weights: tiny per-frequency Hermitian solve (plain JAX) ---
    # TODO(synk): no Pallas primitive for a batched complex Cholesky/LU solve;
    # the B*F tiny 2Mx2M factorizations stay in lax.linalg on the real embedding.
    wr, wi = _solve_bf_weights(target_scm, noise_scm, mu, ref_mic)

    ft, tt, f_pad, t_pad = _plan_blocks(M, F, T, budget)

    # Real/imag extraction of the mixture (complex dtypes are not supported
    # inside Pallas TPU kernels); allow_input_fusion lets XLA fold this strided
    # extract into the pallas_call inputs instead of a materializing HBM pass.
    xr = jnp.real(mix).astype(jnp.float32)                # (B, M, F, T)
    xi = jnp.imag(mix).astype(jnp.float32)

    needs_pad = (f_pad != F) or (t_pad != T)
    if needs_pad:
        # Tiled fallback only: blocks smaller than the array must be
        # (8,128)-aligned, so the mixture is padded (one extra HBM pass).
        pad = ((0, 0), (0, 0), (0, f_pad - F), (0, t_pad - T))
        xr = jnp.pad(xr, pad)
        xi = jnp.pad(xi, pad)
    if f_pad != F:
        # NOTE: weight padding MUST stay zeros so the padded output frequency
        # rows are exactly zero and can be safely sliced away below.
        wpad = ((0, 0), (0, f_pad - F), (0, 0))
        wr = jnp.pad(wr, wpad)
        wi = jnp.pad(wi, wpad)

    out_r, out_i = _apply_beamforming_pallas(wr, wi, xr, xi, ft, tt, vmem_limit)
    if needs_pad:
        out_r = out_r[:, :F, :T]
        out_i = out_i[:, :F, :T]
    if return_real_imag:
        return out_r, out_i                                # skip the complex re-pack
    return lax.complex(out_r, out_i)                       # complex64 (B, F, T)


if __name__ == "__main__":
    import numpy as np

    key = jax.random.PRNGKey(0)

    def _cnormal(kr, ki, shape):
        return (jax.random.normal(kr, shape, jnp.float32)
                + 1j * jax.random.normal(ki, shape, jnp.float32)).astype(jnp.complex64)

    def _make_scm(kr, ki, B, M, F):
        a = _cnormal(kr, ki, (B, F, M, M))
        scm = a @ jnp.conj(jnp.swapaxes(a, -1, -2)) + 0.5 * jnp.eye(M, dtype=jnp.complex64)
        return jnp.transpose(scm, (0, 2, 3, 1))           # -> (B, M, M, F), torch layout

    def _reference(mix, target_scm, noise_scm, mu, ref_mic):
        mixn = np.asarray(mix).astype(np.complex128)
        t = np.transpose(np.asarray(target_scm).astype(np.complex128), (0, 3, 1, 2))
        n = np.transpose(np.asarray(noise_scm).astype(np.complex128), (0, 3, 1, 2))
        bf = np.linalg.solve(t + mu * n, t)[..., ref_mic]  # (B, F, M)
        return np.einsum('bfm,bmft->bft', np.conj(bf), mixn)

    cases = [
        # Common path: whole (M, F, T) batch slab fits the VMEM budget ->
        # full-dim blocks, no mixture padding, no output slicing.
        dict(B=2, M=4, F=16, T=128, mu=1.0, ref_mic=0, budget=None),
        # Non-(8,128)-aligned F / T on the full-block path + mu != 1, ref_mic != 0.
        dict(B=1, M=3, F=9, T=100, mu=2.5, ref_mic=1, budget=None),
        # Force the tiled / padded fallback with a tiny artificial VMEM budget.
        dict(B=1, M=4, F=20, T=300, mu=1.5, ref_mic=2, budget=64 * 1024),
    ]
    for c in cases:
        B, M, F, T = c["B"], c["M"], c["F"], c["T"]
        key, k1, k2, k3, k4, k5, k6 = jax.random.split(key, 7)
        mix = _cnormal(k1, k2, (B, M, F, T))
        target_scm = _make_scm(k3, k4, B, M, F)
        noise_scm = _make_scm(k5, k6, B, M, F)

        out = sdw_mwf_beamformer(mix, target_scm, noise_scm,
                                 mu=c["mu"], ref_mic=c["ref_mic"],
                                 vmem_budget_bytes=c["budget"])
        out = jax.block_until_ready(out)
        assert out.shape == (B, F, T) and out.dtype == jnp.complex64

        ref = _reference(mix, target_scm, noise_scm, c["mu"], c["ref_mic"])
        err = float(np.max(np.abs(np.asarray(out) - ref)))
        scale = float(max(1.0, np.max(np.abs(ref))))
        assert err < 1e-3 * scale, f"max abs error {err} (scale {scale}) for case {c}"

    print("KERNEL_OK")
</pallas_src>

<mosaic_0001>
module attributes {stable_mosaic.version = 11 : i64} {
  func.func @_apply_bf_kernel(%arg0: i32, %arg1: i32, %arg2: i32, %arg3: memref<1x16x4xf32, #tpu.memory_space<vmem>>, %arg4: memref<1x16x4xf32, #tpu.memory_space<vmem>>, %arg5: memref<1x4x16x128xf32, #tpu.memory_space<vmem>>, %arg6: memref<1x4x16x128xf32, #tpu.memory_space<vmem>>, %arg7: memref<1x16x128xf32, #tpu.memory_space<vmem>>, %arg8: memref<1x16x128xf32, #tpu.memory_space<vmem>>) attributes {dimension_semantics = [#tpu.dimension_semantics<parallel>, #tpu.dimension_semantics<parallel>, #tpu.dimension_semantics<parallel>], iteration_bounds = array<i64: 2, 1, 1>, scalar_prefetch = 0 : i64, scratch_operands = 0 : i64, tpu.core_type = #tpu.core_type<tc>, window_params = [{transform_indices = @transform_0, window_bounds = array<i64: 1, 16, 4>}, {transform_indices = @transform_1, window_bounds = array<i64: 1, 16, 4>}, {transform_indices = @transform_2, window_bounds = array<i64: 1, 4, 16, 128>}, {transform_indices = @transform_3, window_bounds = array<i64: 1, 4, 16, 128>}, {transform_indices = @transform_4, window_bounds = array<i64: 1, 16, 128>}, {transform_indices = @transform_5, window_bounds = array<i64: 1, 16, 128>}]} {
    %c0 = arith.constant 0 : index
    %c0_0 = arith.constant 0 : index
    %c0_1 = arith.constant 0 : index
    %0 = vector.load %arg3[%c0, %c0_0, %c0_1] : memref<1x16x4xf32, #tpu.memory_space<vmem>>, vector<1x16x4xf32>
    %1 = vector.shape_cast %0 : vector<1x16x4xf32> to vector<16x4xf32>
    %c0_2 = arith.constant 0 : index
    %c0_3 = arith.constant 0 : index
    %c0_4 = arith.constant 0 : index
    %2 = vector.load %arg4[%c0_2, %c0_3, %c0_4] : memref<1x16x4xf32, #tpu.memory_space<vmem>>, vector<1x16x4xf32>
    %3 = vector.shape_cast %2 : vector<1x16x4xf32> to vector<16x4xf32>
    %c0_5 = arith.constant 0 : index
    %c0_6 = arith.constant 0 : index
    %c0_7 = arith.constant 0 : index
    %c0_8 = arith.constant 0 : index
    %4 = vector.load %arg5[%c0_5, %c0_6, %c0_7, %c0_8] : memref<1x4x16x128xf32, #tpu.memory_space<vmem>>, vector<1x1x16x128xf32>
    %5 = vector.shape_cast %4 : vector<1x1x16x128xf32> to vector<16x128xf32>
    %c0_9 = arith.constant 0 : index
    %c0_10 = arith.constant 0 : index
    %c0_11 = arith.constant 0 : index
    %c0_12 = arith.constant 0 : index
    %6 = vector.load %arg6[%c0_9, %c0_10, %c0_11, %c0_12] : memref<1x4x16x128xf32, #tpu.memory_space<vmem>>, vector<1x1x16x128xf32>
    %7 = vector.shape_cast %6 : vector<1x1x16x128xf32> to vector<16x128xf32>
    %8 = vector.extract_strided_slice %1 {offsets = [0, 0], sizes = [16, 1], strides = [1, 1]} : vector<16x4xf32> to vector<16x1xf32>
    %9 = vector.shape_cast %8 : vector<16x1xf32> to vector<16x1xf32>
    %10 = vector.broadcast %9 : vector<16x1xf32> to vector<16x128xf32>
    %11 = vector.extract_strided_slice %3 {offsets = [0, 0], sizes = [16, 1], strides = [1, 1]} : vector<16x4xf32> to vector<16x1xf32>
    %12 = vector.shape_cast %11 : vector<16x1xf32> to vector<16x1xf32>
    %13 = vector.broadcast %12 : vector<16x1xf32> to vector<16x128xf32>
    %14 = arith.mulf %10, %5 : vector<16x128xf32>
    %15 = arith.mulf %13, %7 : vector<16x128xf32>
    %16 = arith.addf %14, %15 : vector<16x128xf32>
    %17 = arith.mulf %10, %7 : vector<16x128xf32>
    %18 = arith.mulf %13, %5 : vector<16x128xf32>
    %19 = arith.subf %17, %18 : vector<16x128xf32>
    %c0_13 = arith.constant 0 : index
    %c1 = arith.constant 1 : index
    %c0_14 = arith.constant 0 : index
    %c0_15 = arith.constant 0 : index
    %20 = vector.load %arg5[%c0_13, %c1, %c0_14, %c0_15] : memref<1x4x16x128xf32, #tpu.memory_space<vmem>>, vector<1x1x16x128xf32>
    %21 = vector.shape_cast %20 : vector<1x1x16x128xf32> to vector<16x128xf32>
    %c0_16 = arith.constant 0 : index
    %c1_17 = arith.constant 1 : index
    %c0_18 = arith.constant 0 : index
    %c0_19 = arith.constant 0 : index
    %22 = vector.load %arg6[%c0_16, %c1_17, %c0_18, %c0_19] : memref<1x4x16x128xf32, #tpu.memory_space<vmem>>, vector<1x1x16x128xf32>
    %23 = vector.shape_cast %22 : vector<1x1x16x128xf32> to vector<16x128xf32>
    %24 = vector.extract_strided_slice %1 {offsets = [0, 1], sizes = [16, 1], strides = [1, 1]} : vector<16x4xf32> to vector<16x1xf32>
    %25 = vector.shape_cast %24 : vector<16x1xf32> to vector<16x1xf32>
    %26 = vector.broadcast %25 : vector<16x1xf32> to vector<16x128xf32>
    %27 = vector.extract_strided_slice %3 {offsets = [0, 1], sizes = [16, 1], strides = [1, 1]} : vector<16x4xf32> to vector<16x1xf32>
    %28 = vector.shape_cast %27 : vector<16x1xf32> to vector<16x1xf32>
    %29 = vector.broadcast %28 : vector<16x1xf32> to vector<16x128xf32>
    %30 = arith.mulf %26, %21 : vector<16x128xf32>
    %31 = arith.addf %16, %30 : vector<16x128xf32>
    %32 = arith.mulf %29, %23 : vector<16x128xf32>
    %33 = arith.addf %31, %32 : vector<16x128xf32>
    %34 = arith.mulf %26, %23 : vector<16x128xf32>
    %35 = arith.addf %19, %34 : vector<16x128xf32>
    %36 = arith.mulf %29, %21 : vector<16x128xf32>
    %37 = arith.subf %35, %36 : vector<16x128xf32>
    %c0_20 = arith.constant 0 : index
    %c2 = arith.constant 2 : index
    %c0_21 = arith.constant 0 : index
    %c0_22 = arith.constant 0 : index
    %38 = vector.load %arg5[%c0_20, %c2, %c0_21, %c0_22] : memref<1x4x16x128xf32, #tpu.memory_space<vmem>>, vector<1x1x16x128xf32>
    %39 = vector.shape_cast %38 : vector<1x1x16x128xf32> to vector<16x128xf32>
    %c0_23 = arith.constant 0 : index
    %c2_24 = arith.constant 2 : index
    %c0_25 = arith.constant 0 : index
    %c0_26 = arith.constant 0 : index
    %40 = vector.load %arg6[%c0_23, %c2_24, %c0_25, %c0_26] : memref<1x4x16x128xf32, #tpu.memory_space<vmem>>, vector<1x1x16x128xf32>
    %41 = vector.shape_cast %40 : vector<1x1x16x128xf32> to vector<16x128xf32>
    %42 = vector.extract_strided_slice %1 {offsets = [0, 2], sizes = [16, 1], strides = [1, 1]} : vector<16x4xf32> to vector<16x1xf32>
    %43 = vector.shape_cast %42 : vector<16x1xf32> to vector<16x1xf32>
    %44 = vector.broadcast %43 : vector<16x1xf32> to vector<16x128xf32>
    %45 = vector.extract_strided_slice %3 {offsets = [0, 2], sizes = [16, 1], strides = [1, 1]} : vector<16x4xf32> to vector<16x1xf32>
    %46 = vector.shape_cast %45 : vector<16x1xf32> to vector<16x1xf32>
    %47 = vector.broadcast %46 : vector<16x1xf32> to vector<16x128xf32>
    %48 = arith.mulf %44, %39 : vector<16x128xf32>
    %49 = arith.addf %33, %48 : vector<16x128xf32>
    %50 = arith.mulf %47, %41 : vector<16x128xf32>
    %51 = arith.addf %49, %50 : vector<16x128xf32>
    %52 = arith.mulf %44, %41 : vector<16x128xf32>
    %53 = arith.addf %37, %52 : vector<16x128xf32>
    %54 = arith.mulf %47, %39 : vector<16x128xf32>
    %55 = arith.subf %53, %54 : vector<16x128xf32>
    %c0_27 = arith.constant 0 : index
    %c3 = arith.constant 3 : index
    %c0_28 = arith.constant 0 : index
    %c0_29 = arith.constant 0 : index
    %56 = vector.load %arg5[%c0_27, %c3, %c0_28, %c0_29] : memref<1x4x16x128xf32, #tpu.memory_space<vmem>>, vector<1x1x16x128xf32>
    %57 = vector.shape_cast %56 : vector<1x1x16x128xf32> to vector<16x128xf32>
    %c0_30 = arith.constant 0 : index
    %c3_31 = arith.constant 3 : index
    %c0_32 = arith.constant 0 : index
    %c0_33 = arith.constant 0 : index
    %58 = vector.load %arg6[%c0_30, %c3_31, %c0_32, %c0_33] : memref<1x4x16x128xf32, #tpu.memory_space<vmem>>, vector<1x1x16x128xf32>
    %59 = vector.shape_cast %58 : vector<1x1x16x128xf32> to vector<16x128xf32>
    %60 = vector.extract_strided_slice %1 {offsets = [0, 3], sizes = [16, 1], strides = [1, 1]} : vector<16x4xf32> to vector<16x1xf32>
    %61 = vector.shape_cast %60 : vector<16x1xf32> to vector<16x1xf32>
    %62 = vector.broadcast %61 : vector<16x1xf32> to vector<16x128xf32>
    %63 = vector.extract_strided_slice %3 {offsets = [0, 3], sizes = [16, 1], strides = [1, 1]} : vector<16x4xf32> to vector<16x1xf32>
    %64 = vector.shape_cast %63 : vector<16x1xf32> to vector<16x1xf32>
    %65 = vector.broadcast %64 : vector<16x1xf32> to vector<16x128xf32>
    %66 = arith.mulf %62, %57 : vector<16x128xf32>
    %67 = arith.addf %51, %66 : vector<16x128xf32>
    %68 = arith.mulf %65, %59 : vector<16x128xf32>
    %69 = arith.addf %67, %68 : vector<16x128xf32>
    %70 = arith.mulf %62, %59 : vector<16x128xf32>
    %71 = arith.addf %55, %70 : vector<16x128xf32>
    %72 = arith.mulf %65, %57 : vector<16x128xf32>
    %73 = arith.subf %71, %72 : vector<16x128xf32>
    %c0_34 = arith.constant 0 : index
    %c0_35 = arith.constant 0 : index
    %c0_36 = arith.constant 0 : index
    %74 = vector.load %arg7[%c0_34, %c0_35, %c0_36] : memref<1x16x128xf32, #tpu.memory_space<vmem>>, vector<1x16x128xf32>
    %75 = vector.shape_cast %74 : vector<1x16x128xf32> to vector<16x128xf32>
    %76 = vector.shape_cast %69 : vector<16x128xf32> to vector<1x16x128xf32>
    tpu.vector_store %arg7[%c0_34, %c0_35, %c0_36], %76 {strides = array<i32>} : memref<1x16x128xf32, #tpu.memory_space<vmem>>, vector<1x16x128xf32>,
    %c0_37 = arith.constant 0 : index
    %c0_38 = arith.constant 0 : index
    %c0_39 = arith.constant 0 : index
    %77 = vector.load %arg8[%c0_37, %c0_38, %c0_39] : memref<1x16x128xf32, #tpu.memory_space<vmem>>, vector<1x16x128xf32>
    %78 = vector.shape_cast %77 : vector<1x16x128xf32> to vector<16x128xf32>
    %79 = vector.shape_cast %73 : vector<16x128xf32> to vector<1x16x128xf32>
    tpu.vector_store %arg8[%c0_37, %c0_38, %c0_39], %79 {strides = array<i32>} : memref<1x16x128xf32, #tpu.memory_space<vmem>>, vector<1x16x128xf32>,
    return
  }
  func.func @transform_0(%arg0: i32, %arg1: i32, %arg2: i32) -> (i32, i32, i32) {
    %c0_i32 = arith.constant 0 : i32
    %c0_i32_0 = arith.constant 0 : i32
    return %arg0, %arg1, %c0_i32 : i32, i32, i32
  }
  func.func @transform_1(%arg0: i32, %arg1: i32, %arg2: i32) -> (i32, i32, i32) {
    %c0_i32 = arith.constant 0 : i32
    %c0_i32_0 = arith.constant 0 : i32
    return %arg0, %arg1, %c0_i32 : i32, i32, i32
  }
  func.func @transform_2(%arg0: i32, %arg1: i32, %arg2: i32) -> (i32, i32, i32, i32) {
    %c0_i32 = arith.constant 0 : i32
    %c0_i32_0 = arith.constant 0 : i32
    return %arg0, %c0_i32, %arg1, %arg2 : i32, i32, i32, i32
  }
  func.func @transform_3(%arg0: i32, %arg1: i32, %arg2: i32) -> (i32, i32, i32, i32) {
    %c0_i32 = arith.constant 0 : i32
    %c0_i32_0 = arith.constant 0 : i32
    return %arg0, %c0_i32, %arg1, %arg2 : i32, i32, i32, i32
  }
  func.func @transform_4(%arg0: i32, %arg1: i32, %arg2: i32) -> (i32, i32, i32) {
    %c0_i32 = arith.constant 0 : i32
    return %arg0, %arg1, %arg2 : i32, i32, i32
  }
  func.func @transform_5(%arg0: i32, %arg1: i32, %arg2: i32) -> (i32, i32, i32) {
    %c0_i32 = arith.constant 0 : i32
    return %arg0, %arg1, %arg2 : i32, i32, i32
  }
}

</mosaic_0001>

<bundles_post_ra>
// kernel: tpu_custom_call.1
= control target key start
LH: loop header
LB: loop body
LE: loop exit
PB: predicated region body
PF: predicated region fallthrough
CT: control target
= control target key end

     0   :  { %s1370_s0 = inlined_call_operand.vmem [shape: f32[2,16,4], index: 0, kind: input, shape index: {}]   ;;  %s1371_s1 = inlined_call_operand.vmem [shape: f32[2,16,4], index: 1, kind: input, shape index: {}]   ;;  %s1372_s2 = inlined_call_operand.hbm [shape: f32[2,4,16,128], index: 2, kind: input, shape index: {}]   ;;  %s1373_s3 = inlined_call_operand.hbm [shape: f32[2,4,16,128], index: 3, kind: input, shape index: {}]   ;;  %s1374_s4 = inlined_call_operand.hbm [shape: f32[2,16,128], index: 4, kind: output, shape index: {0}]   ;;  %s1375_s5 = inlined_call_operand.hbm [shape: f32[2,16,128], index: 5, kind: output, shape index: {1}]  }
   0x1   :  { %1378 = sst [smem:[#allocation16_spill]] %s1372_s2 }
   0x2   :  { %11 = vsyncpa [#allocation3], 0 }
   0x3   :  { %13 = vsyncpa [#allocation3 + $0x1], 0 }
   0x4   :  { %14 = vsyncpa [#allocation6], 0 }
   0x5   :  { %16 = vsyncpa [#allocation6 + $0x1], 0 }
   0x6   :  { %17 = vsyncpa [#allocation4], 0 }
   0x7   :  { %19 = vsyncpa [#allocation4 + $0x1], 0 }
   0x8   :  { %20 = vsyncpa [#allocation9], 0 }
   0x9   :  { %22 = vsyncpa [#allocation9 + $0x1], 0  ;;  %s1163_s18 = smov 0   ;;  %s1165_s19 = smov 0  }
   0xa   :  { %s1167_s20 = smov 0   ;;  %s1169_s21 = smov 0  }
   0xb   :  { %s1171_s22 = smov 0   ;;  %s1173_s23 = smov 0  }
   0xc LB: > { %1379 = sst [smem:[#allocation14_spill]] %s1119_s22  ;;  %s809_s24 = sadd.s32 4294967295, %s1123_s23   ;;  %s1123_s23 = sphi %s1173_s23, %s28_s23   ;;  %s1119_s22 = sphi %s1171_s22, %s1388_s22   ;;  %s1115_s21 = sphi %s1169_s21, %s1387_s21   ;;  %s1111_s20 = sphi %s1167_s20, %s1391_s20   ;;  %s1107_s19 = sphi %s1165_s19, %s1390_s19   ;;  %s1103_s18 = sphi %s1163_s18, %s1389_s18  }
   0xd   : > { %s810_s25 = sadd.s32 4294967294, %s1123_s23   ;;  %s47_s26 = sadd.s32 1, %s1119_s22 }
   0xe   : > { %s114_s27 = sadd.s32 1, %s1111_s20  ;;  %p49_p0 = scmp.ge.s32.totalorder %s47_s26, 2 }
   0xf   : > { %p121_p1 = scmp.ne.s32.totalorder %s1111_s20, %s1107_s19  ;;  %p122_p2 = scmp.eq.s32.totalorder %s1123_s23, 0 }
  0x10   : > { %p127_p3 = scmp.ne.s32.totalorder %s1107_s19, %s1103_s18  ;;  %s1393_s26 = smov (%p49_p0, %s47_s26), 0 }
  0x11   : > { %1380 = sst [smem:[#allocation15_spill]] %s1393_s26  ;;  %p1204_p4 = por %p122_p2, %p121_p1 }
  0x12   : > { %p128_p5 = scmp.eq.s32.totalorder %s809_s24, 0  ;;  %s107_s29 = ssub.s32 %s1119_s22, %s1393_s26 }
  0x13   : > { %p185_p6 = scmp.eq.s32.totalorder %s809_s24, 1  ;;  %p112_p7 = scmp.eq.s32.totalorder %s107_s29, 0 }
  0x14   : > { %p1210_p8 = por %p128_p5, %p127_p3  ;;  %p191_p10 = scmp.eq.s32.totalorder %s810_s25, 1 }
  0x15   : > { %p1214_p9 = por %p185_p6, %p121_p1  ;;  %p812_p12 = scmp.ge.s32.totalorder %s1123_s23, 2 }
  0x16   : > { %s1219_s7 = scalar_select %p112_p7, %s1111_s20, %s114_s27  }
  0x17   : > { %p1221_p11 = por %p191_p10, %p127_p3  ;;  %p876_p13 = scmp.lt.s32.totalorder %s1123_s23, 2 }
  0x18   : > { %s1228_s9 = sand.u32 1, %s1111_s20   ;;  %s848_s11 = sshll.u32 %s1119_s22, 6 }
  0x19   : > { %s813_s10 = sshll.u32 %s1228_s9, 6  ;;  %s1385_s2 = sld [smem:[#allocation16_spill]] }
  0x1a   : > { %s271_s15 = scalar_lea.vmem [#allocation2], %s813_s10  ;;  %p1237_p0 = pnand %p876_p13, %p1204_p4 }
  0x1b   : > { %s282_s16 = sshll.u32 %s271_s15, 4  ;;  %p819_p1 = scmp.ge.s32.totalorder %s1123_s23, 1  ;;  %s283_s16 = int_to_ptr.vmem [resolvable:$true] %s282_s16 }
  0x1c   : > { %s268_s25 = scalar_lea.sflag [#allocation3], %s1228_s9  ;;  %s1125_s27 = smov 128  }
  0x1d   : > { %s1126_s29 = smov 8   ;;  %p315_p2 = scmp.lt.s32.totalorder %s1123_s23, 3 }
  0x1e   : > { %s296_s28 = scalar_lea.vmem [#allocation5], %s813_s10  ;;  %s293_s26 = scalar_lea.sflag [#allocation6], %s1228_s9 }
  0x1f   : > { %s279_s14 = scalar_lea.hbm %s1385_s2, %s848_s11  ;;  %p316_p3 = pnand %p819_p1, %p315_p2 }
  0x20   : > { %s280_s17 = sshll.u32 %s279_s14, 4  ;;  %s304_s14 = scalar_lea.hbm %s1373_s3, %s848_s11  ;;  %s281_s17 = int_to_ptr.hbm [resolvable:$true] %s280_s17 }
  0x21   : > { %865 = dma.hbm_to_vmem [thread:$0]  (!%p1237_p0), %s281_s17, 1024, %s283_s16, %s268_s25, %s1125_s27, %s1125_s27, %s1126_s29  }
  0x22   : > { %s305_s15 = sshll.u32 %s304_s14, 4  ;;  %s307_s2 = sshll.u32 %s296_s28, 4  ;;  %s306_s15 = int_to_ptr.hbm [resolvable:$true] %s305_s15  ;;  %s308_s2 = int_to_ptr.vmem [resolvable:$true] %s307_s2 }
  0x23   : > { %868 = dma.hbm_to_vmem [thread:$0]  (!%p1237_p0), %s306_s15, 1024, %s308_s2, %s293_s26, %s1125_s27, %s1125_s27, %s1126_s29  }
  0x24   : > { %319 = sbr.rel (%p316_p3) target bundleno = 230 (0xe6), region = 36  ;;  %s1253_s22 = sand.u32 (!%p316_p3), 1, %s1107_s19  }
  0x25   : > { %s820_s16 = sshll.u32 (!%p316_p3), %s1253_s22, 6  ;;  %s322_s17 = scalar_lea.sflag (!%p316_p3), [#allocation3], %s1253_s22 }
  0x26   : > { %s1257_s25 = scalar_lea.vmem (!%p316_p3), [#allocation2], %s820_s16 }
  0x29   : > { %1086 = dma.done.wait (%p1210_p8), %s322_s17, 1024  }
  0x2a   : > { %1088 = vsyncadd (%p1210_p8), %s322_s17, 4294966272  ;;  %s332_s9 = scalar_lea.sflag [#allocation6], %s1253_s22  ;;  %s1264_s2 = scalar_lea.vmem [#allocation5], %s820_s16 }
  0x2b   : > { %1090 = dma.done.wait (%p1210_p8), %s332_s9, 1024  }
  0x2c   : > { %1092 = vsyncadd (%p1210_p8), %s332_s9, 4294966272  ;;  %p392_p4 = scmp.lt.s32.totalorder %s1115_s21, 1  ;;  %v1127_v0 = vmov 0   ;;  %v1128_v1 = vmov 1   ;;  %v1129_v6 = vmov 2   ;;  %v1130_v7 = vmov 3  }
  0x2d   : > { %935 = vset.pattern.permute.xlu1 %v1127_v0  ;;  %934 = vset.pattern.permute.xlu0 %v1127_v0  ;;  %v420_v16 = vld [vmem:[%s1257_s25 + $0x8] sm:$0xff]  ;;  %v829_v25 = vld [vmem:[%s1257_s25 + $0x18] sm:$0xff]  ;;  %v419_v27 = vld [vmem:[%s1257_s25] sm:$0xff]  ;;  %s822_s30 = sshll.u32 %s1253_s22, 4  ;;  %s852_s15 = sshll.u32 %s1115_s21, 4 }
  0x2e   : > { %s393_s26 = scalar_select %p392_p4, %s1115_s21, 1  ;;  %936 = vset.pattern.permute.xlu2 %v1128_v1  ;;  %v422_v17 = vld [vmem:[%s1264_s2 + $0x8] sm:$0xff]  ;;  %v831_v26 = vld [vmem:[%s1264_s2 + $0x18] sm:$0xff]  ;;  %v421_v28 = vld [vmem:[%s1264_s2] sm:$0xff] }
  0x2f   : > { %v833_v41 = vld [vmem:[%s1257_s25 + $0x28] sm:$0xff]  ;;  %v828_v43 = vld [vmem:[%s1257_s25 + $0x10] sm:$0xff]  ;;  %v837_v49 = vld [vmem:[%s1257_s25 + $0x38] sm:$0xff]  ;;  %s1299_s14 = scalar_lea.vmem [#allocation7], %s822_s30  ;;  %s390_s28 = scalar_lea.vmem [#allocation8], %s822_s30 }
  0x30   : > { %s850_s10 = sshll.u32 %s393_s26, 4  ;;  %v835_v42 = vld [vmem:[%s1264_s2 + $0x28] sm:$0xff]  ;;  %v830_v44 = vld [vmem:[%s1264_s2 + $0x10] sm:$0xff]  ;;  %v839_v50 = vld [vmem:[%s1264_s2 + $0x38] sm:$0xff]  ;;  %s593_s9 = scalar_lea.hbm %s1374_s4, %s852_s15 }
  0x31   : > { %s409_s27 = scalar_lea.vmem %s1371_s1, %s850_s10  ;;  %s399_s13 = scalar_lea.vmem %s1370_s0, %s850_s10 }
  0x32   : > { %v417_v2 = vld [vmem:[%s409_s27] sm:$0xff]  ;;  %v418_v4 = vld [vmem:[%s409_s27 + $0x8] sm:$0xff]  ;;  %s594_s26 = sshll.u32 %s1299_s14, 4  ;;  %s614_s10 = sshll.u32 %s390_s28, 4  ;;  %s1314_s26 = int_to_ptr.vmem [resolvable:$true] %s594_s26  ;;  %s1316_s10 = int_to_ptr.vmem [resolvable:$true] %s614_s10 }
  0x33   : > { %v415_v3 = vld [vmem:[%s399_s13] sm:$0xff]  ;;  %435 = vperm.xlu1 %935, %v417_v2   ;;  %v416_v5 = vld [vmem:[%s399_s13 + $0x8] sm:$0xff]  ;;  %s596_s11 = sshll.u32 %s593_s9, 4  ;;  %s574_s27 = scalar_lea.sflag [#allocation4], %s1253_s22  ;;  %s597_s11 = int_to_ptr.hbm [resolvable:$true] %s596_s11 }
  0x34   : > { %425 = vperm.xlu0 %934, %v415_v3   ;;  %462 = vperm.xlu2 %936, %v415_v3   ;;  %s1019_s29 = sshra.s32 %s597_s11, 4  ;;  %s1020_s29 = int_to_ptr.hbm [resolvable:$true] %s1019_s29 }
  0x35   : > { %s1021_s12 = scalar_lea.hbm %s1020_s29, 16  ;;  %p1026_p8 = scmp.lt.s32.totalorder %s1020_s29, %s1374_s4 }
  0x36   : > { %p1022_p5 = scmp.ne.s32.totalorder %s1020_s29, %s1021_s12 }
  0x38   : > { %p1023_p6 = pnand %p1022_p5, %p1214_p9 }
  0x3a   : > { %p1024_p7 = pneg %p1023_p6 }
  0x3b   : > { %440 = vperm.xlu1 %935, %v418_v4  }
  0x3c   : > { %430 = vperm.xlu0 %934, %v416_v5   ;;  %466 = vperm.xlu2 %936, %v416_v5  }
  0x43   : > { %938 = vset.pattern.permute.xlu1 %v1128_v1 }
  0x44   : > { %937 = vset.pattern.permute.xlu0 %v1128_v1  ;;  %474 = vperm.xlu1 %938, %v418_v4  }
  0x45   : > { %470 = vperm.xlu0 %937, %v417_v2   ;;  %939 = vset.pattern.permute.xlu2 %v1129_v6 }
  0x46   : > { %500 = vperm.xlu2 %939, %v415_v3  }
  0x4c   : > { %940 = vset.pattern.permute.xlu1 %v1129_v6 }
  0x4d   : > { %941 = vset.pattern.permute.xlu0 %v1129_v6  ;;  %504 = vperm.xlu1 %940, %v416_v5  }
  0x4e   : > { %512 = vperm.xlu0 %941, %v418_v4   ;;  %508 = vperm.xlu2 %939, %v417_v2  }
  0x55   : > { %942 = vset.pattern.permute.xlu1 %v1130_v7 }
  0x56   : > { %944 = vset.pattern.permute.xlu0 %v1130_v7  ;;  %538 = vperm.xlu1 %942, %v415_v3   ;;  %v834_v3 = vld [vmem:[%s1264_s2 + $0x20] sm:$0xff] }
  0x57   : > { %943 = vset.pattern.permute.xlu2 %v1130_v7 }
  0x58   : > { %542 = vperm.xlu2 %943, %v416_v5  }
  0x5e   : > { %546 = vperm.xlu1 %942, %v417_v2   ;;  %v832_v2 = vld [vmem:[%s1257_s25 + $0x20] sm:$0xff] }
  0x60   : > { %550 = vperm.xlu2 %943, %v418_v4  }
  0x8e   : > { %v463_v8 = vpop.permute.xlu2 %462 }
  0x8f   : > { %v477_v55 = vmul.f32 %v828_v43, %v463_v8  ;;  %v485_v56 = vmul.f32 %v830_v44, %v463_v8 }
  0x96   : > { %v467_v9 = vpop.permute.xlu2 %466 }
  0x97   : > { %v478_v31 = vmul.f32 %v829_v25, %v467_v9  ;;  %v486_v32 = vmul.f32 %v831_v26, %v467_v9 }
  0xa0   : > { %v1278_v10 = vpop.permute.xlu2 %500 }
  0xa5   : > { %v436_v11 = vpop.permute.xlu1 %435 }
  0xa6   : > { %v426_v12 = vpop.permute.xlu0 %425  ;;  %v445_v35 = vmul.f32 %v436_v11, %v421_v28  ;;  %v451_v36 = vmul.f32 %v436_v11, %v419_v27 }
  0xa7   : > { %v443_v37 = vmul.f32 %v426_v12, %v419_v27  ;;  %v449_v38 = vmul.f32 %v426_v12, %v421_v28 }
  0xa8   : > { %v1280_v13 = vpop.permute.xlu2 %508 }
  0xa9   : > { %v447_v57 = vadd.f32 %v445_v35, %v443_v37  ;;  %v453_v58 = vsub.f32 %v449_v38, %v451_v36 }
  0xab   : > { %v479_v8 = vadd.f32 %v477_v55, %v447_v57  ;;  %v487_v9 = vadd.f32 %v485_v56, %v453_v58 }
  0xad   : > { %v441_v14 = vpop.permute.xlu1 %440 }
  0xae   : > { %v431_v15 = vpop.permute.xlu0 %430  ;;  %v446_v18 = vmul.f32 %v441_v14, %v422_v17  ;;  %v452_v19 = vmul.f32 %v441_v14, %v420_v16  ;;  %v515_v14 = vmul.f32 %v832_v2, %v1278_v10 }
  0xaf   : > { %v444_v20 = vmul.f32 %v431_v15, %v420_v16  ;;  %v450_v21 = vmul.f32 %v431_v15, %v422_v17  ;;  %v523_v15 = vmul.f32 %v834_v3, %v1278_v10  ;;  %v527_v10 = vmul.f32 %v832_v2, %v1280_v13 }
  0xb1   : > { %v448_v29 = vadd.f32 %v446_v18, %v444_v20  ;;  %v454_v30 = vsub.f32 %v450_v21, %v452_v19  ;;  %v836_v21 = vld [vmem:[%s1257_s25 + $0x30] sm:$0xff] }
  0xb2   : > { %v543_v24 = vpop.permute.xlu2 %542 }
  0xb3   : > { %v480_v39 = vadd.f32 %v478_v31, %v448_v29  ;;  %v488_v40 = vadd.f32 %v486_v32, %v454_v30  ;;  %v554_v62 = vmul.f32 %v837_v49, %v543_v24  ;;  %v562_v63 = vmul.f32 %v839_v50, %v543_v24 }
  0xb6   : > { %v475_v22 = vpop.permute.xlu1 %474 }
  0xb7   : > { %v471_v23 = vpop.permute.xlu0 %470  ;;  %v482_v33 = vmul.f32 %v831_v26, %v475_v22  ;;  %v490_v34 = vmul.f32 %v829_v25, %v475_v22  ;;  %v838_v22 = vld [vmem:[%s1264_s2 + $0x30] sm:$0xff]  ;;  %v519_v25 = vmul.f32 %v834_v3, %v1280_v13  ;;  %s613_s2 = scalar_lea.hbm %s1375_s5, %s852_s15  ;;  %s1025_s15 = scalar_lea.hbm %s1374_s4, 32 }
  0xb8   : > { %v481_v0 = vmul.f32 %v830_v44, %v471_v23  ;;  %v489_v1 = vmul.f32 %v828_v43, %v471_v23  ;;  %s616_s24 = sshll.u32 %s613_s2, 4  ;;  %p1027_p10 = scmp.lt.s32.totalorder %s1025_s15, %s1021_s12  ;;  %s1319_s24 = int_to_ptr.hbm [resolvable:$true] %s616_s24 }
  0xb9   : > { %v484_v45 = vadd.f32 %v482_v33, %v480_v39  ;;  %v492_v46 = vsub.f32 %v488_v40, %v490_v34 }
  0xba   : > { %v551_v59 = vpop.permute.xlu2 %550  ;;  %v483_v16 = vadd.f32 %v481_v0, %v479_v8  ;;  %v491_v17 = vsub.f32 %v487_v9, %v489_v1  ;;  %p1028_p13 = por %p1027_p10, %p1026_p8 }
  0xbb   : > { %v558_v6 = vmul.f32 %v839_v50, %v551_v59  ;;  %v566_v7 = vmul.f32 %v837_v49, %v551_v59 }
  0xbc   : > { %v517_v23 = vadd.f32 %v515_v14, %v483_v16  ;;  %v525_v24 = vadd.f32 %v523_v15, %v491_v17  ;;  %p1029_p0 = pnand %p1028_p13, %p1024_p7 }
  0xbe   : > { %v521_v28 = vadd.f32 %v519_v25, %v517_v23  ;;  %v529_v29 = vsub.f32 %v525_v24, %v527_v10 }
  0xbf   : > { %v505_v47 = vpop.permute.xlu1 %504 }
  0xc0   : > { %v513_v48 = vpop.permute.xlu0 %512  ;;  %v516_v51 = vmul.f32 %v833_v41, %v505_v47  ;;  %v524_v52 = vmul.f32 %v835_v42, %v505_v47 }
  0xc1   : > { %v520_v53 = vmul.f32 %v835_v42, %v513_v48  ;;  %v528_v54 = vmul.f32 %v833_v41, %v513_v48 }
  0xc2   : > { %v518_v60 = vadd.f32 %v516_v51, %v484_v45  ;;  %v526_v61 = vadd.f32 %v524_v52, %v492_v46 }
  0xc4   : > { %v522_v4 = vadd.f32 %v520_v53, %v518_v60  ;;  %v530_v5 = vsub.f32 %v526_v61, %v528_v54 }
  0xc6   : > { %v556_v11 = vadd.f32 %v554_v62, %v522_v4  ;;  %v564_v12 = vadd.f32 %v562_v63, %v530_v5 }
  0xc8   : > { %v560_v18 = vadd.f32 %v558_v6, %v556_v11  ;;  %v568_v19 = vsub.f32 %v564_v12, %v566_v7  ;;  %v539_v20 = vpop.permute.xlu1 %538 }
  0xc9   : > { %v553_v26 = vmul.f32 %v836_v21, %v539_v20  ;;  %v561_v27 = vmul.f32 %v838_v22, %v539_v20 }
  0xca   : > { %570 = vst [vmem:[%s1299_s14 + $0x8] sm:$0xff] %v560_v18 }
  0xcb   : > { %572 = vst [vmem:[%s390_s28 + $0x8] sm:$0xff] %v568_v19  ;;  %v555_v13 = vadd.f32 %v553_v26, %v521_v28  ;;  %v563_v32 = vadd.f32 %v561_v27, %v529_v29 }
  0xd0   : > { %v547_v30 = vpop.permute.xlu1 %546 }
  0xd1   : > { %v557_v31 = vmul.f32 %v838_v22, %v547_v30  ;;  %v565_v33 = vmul.f32 %v836_v21, %v547_v30 }
  0xd3   : > { %v559_v34 = vadd.f32 %v557_v31, %v555_v13  ;;  %v567_v35 = vsub.f32 %v563_v32, %v565_v33 }
  0xd5   : > { %569 = vst [vmem:[%s1299_s14] sm:$0xff] %v559_v34 }
  0xd6   : > { %571 = vst [vmem:[%s390_s28] sm:$0xff] %v567_v35 }
  0xd7   : > { %1032 = shalt.err (!%p1029_p0)
}
  0xd8   : > { %s1131_s14 = smov 128   ;;  %s1132_s28 = smov 8  }
  0xd9   : > { %858 = dma.vmem_to_hbm [thread:$0]  (%p1214_p9), %s1314_s26, 256, %s597_s11, %s574_s27, %s1131_s14, %s1131_s14, %s1132_s28  }
  0xda   : > { %s579_s9 = scalar_lea.sflag [#allocation9], %s1253_s22  ;;  %s1047_s21 = sshra.s32 %s1319_s24, 4  ;;  %s1048_s21 = int_to_ptr.hbm [resolvable:$true] %s1047_s21 }
  0xdb   : > { %s1049_s25 = scalar_lea.hbm %s1048_s21, 16  ;;  %s1053_s12 = scalar_lea.hbm %s1375_s5, 32 }
  0xdc   : > { %p1050_p1 = scmp.ne.s32.totalorder %s1048_s21, %s1049_s25  ;;  %p1054_p4 = scmp.lt.s32.totalorder %s1048_s21, %s1375_s5 }
  0xdd   : > { %p1055_p5 = scmp.lt.s32.totalorder %s1053_s12, %s1049_s25 }
  0xde   : > { %p1051_p2 = pnand %p1050_p1, %p1214_p9 }
  0xdf   : > { %p1056_p6 = por %p1055_p5, %p1054_p4 }
  0xe0   : > { %p1052_p3 = pneg %p1051_p2 }
  0xe2   : > { %p1057_p7 = pnand %p1056_p6, %p1052_p3 }
  0xe4   : > { %1060 = shalt.err (!%p1057_p7)
}
  0xe5   : > { %859 = dma.vmem_to_hbm [thread:$0]  (%p1214_p9), %s1316_s10, 256, %s1319_s24, %s579_s9, %s1131_s14, %s1131_s14, %s1132_s28  }
  0xe6 PF: > { %s631_s22 = sand.u32 1, %s1103_s18   ;;  %p870_p8 = pnand %p812_p12, %p1221_p11 }
  0xe7   : > { %s632_s26 = scalar_lea.sflag [#allocation4], %s631_s22 }
  0xe8   : > { %p871_p10 = pneg %p870_p8 }
  0xea   : > { %1094 = dma.done.wait (%p871_p10), %s632_s26, 256  }
  0xeb   : > { %1096 = vsyncadd (%p871_p10), %s632_s26, 4294967040  ;;  %s642_s11 = scalar_lea.sflag [#allocation9], %s631_s22 }
  0xec   : > { %1098 = dma.done.wait (%p871_p10), %s642_s11, 256  }
  0xed   : > { %1100 = vsyncadd (%p871_p10), %s642_s11, 4294967040  ;;  %s28_s23 = sadd.s32 1, %s1123_s23   ;;  %s1387_s21 = sld [smem:[#allocation14_spill]] }
  0xee   : > { %p25_p13 = scmp.ge.s32.totalorder %s28_s23, 4   ;;  %s1388_s22 = sld [smem:[#allocation15_spill]] }
  0xef   : > { %s1389_s18 = smov %s1107_s19  ;;  %s1390_s19 = smov %s1111_s20 }
  0xf0   : > { %s1391_s20 = smov %s1219_s7  ;;  %27 = sbr.rel (!%p25_p13) target bundleno = 12 (0xc), region = 123 }
  0xf5   :  { %648 = vsyncpa [#allocation3], 1 }
  0xf6   :  { %650 = vsyncpa [#allocation3 + $0x1], 1 }
  0xf7   :  { %651 = vsyncpa [#allocation6], 1 }
  0xf8   :  { %653 = vsyncpa [#allocation6 + $0x1], 1 }
  0xf9   :  { %654 = vsyncpa [#allocation4], 1 }
  0xfa   :  { %656 = vsyncpa [#allocation4 + $0x1], 1 }
  0xfb   :  { %657 = vsyncpa [#allocation9], 1 }
  0xfc   :  { %659 = vsyncpa [#allocation9 + $0x1], 1 }

</bundles_post_ra>
